<compile_context>
chip_gen: v7x
topology: tpu7x:2x2x1
jax: 0.10.0
libtpu: 0.0.40
codegen_flags: <defaults>
</compile_context>

<pallas_src>
import functools

import jax
import jax.numpy as jnp
from jax.experimental import pallas as pl
from jax.experimental.pallas import tpu as pltpu

ATT_DIM = 32  # attention_linear output width / attention_context length


# ----------------------------------------------------------------------------
# Packed-weight slab layouts.
#   * bf16 "matmul" slab : MXU weights (row starts 16-aligned -> bf16 sublane
#     packing, clean static sub-window slices).
#   * f32  "vector" slab : biases / attention context / classifier columns
#     (row starts 8-aligned).
# ----------------------------------------------------------------------------
def _mm_layout(input_dim, h1, h2):
    def align16(r):
        return -(-r // 16) * 16

    sections = [
        ("w1f", 2 * input_dim, h1),   # [W1_self; W1_neigh]
        ("w2f", 2 * h1, h2),          # [W2_self; W2_neigh]
        ("watt", h2, ATT_DIM),        # attention_linear weight
    ]
    offsets, row, width = {}, 0, 0
    for name, r, c in sections:
        offsets[name] = (row, r, c)
        row += align16(r)
        width = max(width, c)
    return offsets, row, width


def _vec_layout(h1, h2):
    hc = h2 // 2

    def align8(r):
        return -(-r // 8) * 8

    sections = [
        ("b1", 1, h1),
        ("b2", 1, h2),
        ("batt", 1, ATT_DIM),
        ("ctx", 1, ATT_DIM),          # attention_context (row form)
        ("wc1t", hc, h2),             # classifier linear1 weight, TRANSPOSED
        ("bc1c", hc, 1),              # classifier linear1 bias (column form)
        ("wc2c", hc, 1),              # classifier linear2 weight (column form)
        ("bc2", 1, 1),                # classifier linear2 bias
    ]
    offsets, row, width = {}, 0, 0
    for name, r, c in sections:
        offsets[name] = (row, r, c)
        row += align8(r)
        width = max(width, c)
    return offsets, row, width


def pack_params(params, input_dim=16, hidden_dims=(64, 32)):
    """Pack weights into (bf16 matmul slab, f32 vector slab).

    NOTE on conventions: expects [in, out]-shaped dense weights (as produced
    by make_params below).  PyTorch nn.Linear / SAGEConv state_dicts store
    [out, in] weights and SAGEConv's lin_l / lin_r are the *neighbor* / *self*
    transforms — transpose and reorder accordingly before packing torch
    weights, or the fused [x, agg] @ [W_self; W_neigh] silently goes wrong.
    """
    h1, h2 = hidden_dims
    hc = h2 // 2
    off_mm, rows_mm, width_mm = _mm_layout(input_dim, h1, h2)
    off_vec, rows_vec, width_vec = _vec_layout(h1, h2)

    mm_vals = {
        "w1f": jnp.concatenate([params["w1s"], params["w1n"]], axis=0),
        "w2f": jnp.concatenate([params["w2s"], params["w2n"]], axis=0),
        "watt": params["watt"],
    }
    vec_vals = {
        "b1": params["b1"].reshape(1, h1),
        "b2": params["b2"].reshape(1, h2),
        "batt": params["batt"].reshape(1, ATT_DIM),
        "ctx": params["ctx"].reshape(1, ATT_DIM),
        "wc1t": params["wc1"].T,
        "bc1c": params["bc1"].reshape(hc, 1),
        "wc2c": params["wc2"].reshape(hc, 1),
        "bc2": params["bc2"].reshape(1, 1),
    }
    mm_slab = jnp.zeros((rows_mm, width_mm), jnp.bfloat16)
    for name, (r0, r, c) in off_mm.items():
        mm_slab = mm_slab.at[r0:r0 + r, 0:c].set(mm_vals[name].astype(jnp.bfloat16))
    vec_slab = jnp.zeros((rows_vec, width_vec), jnp.float32)
    for name, (r0, r, c) in off_vec.items():
        vec_slab = vec_slab.at[r0:r0 + r, 0:c].set(vec_vals[name].astype(jnp.float32))
    return mm_slab, vec_slab


# ----------------------------------------------------------------------------
# Pallas kernel: full forward for ONE graph (2x fused SAGEConv + attention +
# mean-pool + MLP classifier).  The batch axis is the pallas grid.
# ----------------------------------------------------------------------------
def make_ionm_gnn_kernel(input_dim, h1, h2):
    off_mm, _, _ = _mm_layout(input_dim, h1, h2)
    off_vec, _, _ = _vec_layout(h1, h2)

    def kernel(x_ref, a_ref, wmm_ref, wvec_ref, out_ref):
        def mm(name):
            r0, r, c = off_mm[name]
            return wmm_ref[r0:r0 + r, 0:c]        # bf16, static sub-window load

        def vec(name):
            r0, r, c = off_vec[name]
            return wvec_ref[r0:r0 + r, 0:c]       # f32, static sub-window load

        x = x_ref[...]                            # [N, Din] f32
        a = a_ref[...]                            # [N, N]  bf16 row-normalized adjacency
        alerts = x[:, -1:]                        # [N, 1]  f32 IONM alert flags
        x16 = x.astype(jnp.bfloat16)

        # ---- conv1 (fused self+neighbor, bf16 MXU, f32 accumulate) + ReLU ----
        agg1 = jnp.dot(a, x16, preferred_element_type=jnp.float32)        # [N, Din]
        z1 = jnp.concatenate([x16, agg1.astype(jnp.bfloat16)], axis=1)    # [N, 2*Din]
        h1a = jnp.maximum(
            jnp.dot(z1, mm("w1f"), preferred_element_type=jnp.float32)
            + vec("b1"), 0.0)                                             # [N, H1] f32
        # F.dropout(training=False) -> identity
        h1a16 = h1a.astype(jnp.bfloat16)

        # ---- conv2 (fused, K = 2*H1 = 128) + ReLU ----------------------------
        agg2 = jnp.dot(a, h1a16, preferred_element_type=jnp.float32)      # [N, H1]
        z2 = jnp.concatenate([h1a16, agg2.astype(jnp.bfloat16)], axis=1)  # [N, 2*H1]
        h2a = jnp.maximum(
            jnp.dot(z2, mm("w2f"), preferred_element_type=jnp.float32)
            + vec("b2"), 0.0)                                             # [N, H2] f32

        # ---- attention (alert boost +0.4, softmax over nodes) — f32 VPU/EUP --
        scores = jnp.tanh(
            jnp.dot(h2a.astype(jnp.bfloat16), mm("watt"),
                    preferred_element_type=jnp.float32) + vec("batt"))    # [N, 32]
        # context dot has N=1 output -> VPU mul + lane reduce, keep MXU free
        att = jnp.sum(scores * vec("ctx"), axis=-1, keepdims=True)        # [N, 1]
        att = att + alerts * 0.4
        att = att - jnp.max(att, axis=0, keepdims=True)
        e = jnp.exp(att)
        att = e * pl.reciprocal(jnp.sum(e, axis=0, keepdims=True), approx=True)
        h = h2a * att                                                     # [N, H2]

        # ---- mean pool over nodes --------------------------------------------
        pooled = jnp.mean(h, axis=0, keepdims=True)                       # [1, H2]

        # ---- classifier: Linear -> ReLU -> (Dropout=id) -> Linear -> Sigmoid -
        # M=1 matmuls as broadcast-multiply + reductions (weights pre-transposed
        # / stored as columns in the slab: no in-kernel transposes).
        c1 = jnp.maximum(
            jnp.sum(pooled * vec("wc1t"), axis=-1, keepdims=True)
            + vec("bc1c"), 0.0)                                           # [H2//2, 1]
        logit = (jnp.sum(c1 * vec("wc2c"), axis=0, keepdims=True)
                 + vec("bc2"))                                            # [1, 1]
        # Exact sigmoid: single scalar, approx reciprocal could saturate to 0/1.
        out_ref[...] = 1.0 / (1.0 + jnp.exp(-logit))

    return kernel


# ----------------------------------------------------------------------------
# Wrapper (plain-JAX glue + pallas_call)
# ----------------------------------------------------------------------------
def build_mean_aggregation(edge_index, num_nodes):
    """A[i, j] = 1/deg_in(i) for each edge j -> i, via O(E) scatter-add (bf16)."""
    src, dst = edge_index[0], edge_index[1]
    adj = jnp.zeros((num_nodes, num_nodes), jnp.float32).at[dst, src].add(1.0)
    deg = jnp.maximum(jnp.sum(adj, axis=1, keepdims=True), 1.0)
    return (adj / deg).astype(jnp.bfloat16)
    # TODO(synk): for realistic sparse graphs, skip the dense A entirely and do
    #             segment_sum(x[src], dst)/deg in the wrapper (or CSR scalar
    #             prefetch + DMA gather in-kernel).


def _vmem_limit_bytes(n, din, h1, h2, mm_bytes, vec_bytes):
    """Rough per-call VMEM budget: double-buffered blocks + f32 intermediates."""
    a_blk = n * n * 2                     # bf16 A panel
    x_blk = n * din * 4
    inter = 4 * n * (2 * din + 2 * h1 + 3 * h2 + ATT_DIM + 8)
    total = 2 * (a_blk + x_blk + mm_bytes + vec_bytes + 128) + 2 * inter
    return int(min(max(4 * total, 4 << 20), 96 << 20))


@functools.partial(jax.jit, static_argnames=("hidden_dims",))
def ionm_gnn_forward(x, edge_index, w_mm, w_vec, hidden_dims=(64, 32)):
    """x: [B, N, Din] f32 (last feature = alert flag); edge_index: [B, 2, E] i32."""
    b, n, input_dim = x.shape
    h1, h2 = hidden_dims
    a = jax.vmap(build_mean_aggregation, in_axes=(0, None))(edge_index, n)
    kernel = make_ionm_gnn_kernel(input_dim, h1, h2)
    vmem = _vmem_limit_bytes(n, input_dim, h1, h2,
                             w_mm.size * 2, w_vec.size * 4)
    out = pl.pallas_call(
        kernel,
        out_shape=jax.ShapeDtypeStruct((b, 1, 1), jnp.float32),
        grid_spec=pltpu.PrefetchScalarGridSpec(
            num_scalar_prefetch=0,
            grid=(b,),                                         # one graph per step
            in_specs=[
                pl.BlockSpec((None, n, input_dim), lambda i: (i, 0, 0)),
                pl.BlockSpec((None, n, n), lambda i: (i, 0, 0)),
                pl.BlockSpec(w_mm.shape, lambda i: (0, 0)),    # resident weights
                pl.BlockSpec(w_vec.shape, lambda i: (0, 0)),
            ],
            out_specs=pl.BlockSpec((None, 1, 1), lambda i: (i, 0, 0)),
        ),
        compiler_params=pltpu.CompilerParams(
            dimension_semantics=("parallel",),   # shard graphs across TCs (v7x)
            vmem_limit_bytes=vmem),
    )(x, a, w_mm, w_vec)
    return out.reshape(b, 1)
    # TODO(synk): for large N, add a second grid axis row-tiling A (reduction
    #             axis "arbitrary", softmax/pool stats carried in scratch).


# ----------------------------------------------------------------------------
# Deterministic parameter construction (matches IONMGNNModel.__init__ shapes)
# ----------------------------------------------------------------------------
def make_params(key, input_dim=16, hidden_dims=(64, 32)):
    h1, h2 = hidden_dims
    hc = h2 // 2
    ks = jax.random.split(key, 8)

    def w(k, shape, scale=0.1):
        return jax.random.normal(k, shape, jnp.float32) * scale

    return {
        # conv1: SAGEConv(input_dim -> h1)
        "w1s": w(ks[0], (input_dim, h1)),
        "w1n": w(ks[1], (input_dim, h1)),
        "b1": jnp.zeros((h1,), jnp.float32),
        # conv2: SAGEConv(h1 -> h2)
        "w2s": w(ks[2], (h1, h2)),
        "w2n": w(ks[3], (h1, h2)),
        "b2": jnp.zeros((h2,), jnp.float32),
        # attention_linear: Linear(h2 -> 32), attention_context: randn(32)
        "watt": w(ks[4], (h2, ATT_DIM)),
        "batt": jnp.zeros((ATT_DIM,), jnp.float32),
        "ctx": w(ks[5], (ATT_DIM,), scale=1.0),
        # classifier: Linear(h2 -> h2//2) -> ReLU -> Dropout -> Linear(h2//2 -> 1) -> Sigmoid
        "wc1": w(ks[6], (h2, hc)),
        "bc1": jnp.zeros((hc,), jnp.float32),
        "wc2": w(ks[7], (hc, 1)),
        "bc2": jnp.zeros((1,), jnp.float32),
    }


if __name__ == "__main__":
    key = jax.random.PRNGKey(0)
    k_x, k_p = jax.random.split(key)

    # Two small graphs (batch grid axis -> both v7x TensorCores), 8 nodes each,
    # 16 input features (last feature = IONM alert flag).
    batch, n_nodes, input_dim = 2, 8, 16
    x = jax.random.normal(k_x, (batch, n_nodes, input_dim), jnp.float32)
    alert_flags = jnp.array([[0, 1, 0, 0, 1, 0, 0, 1],
                             [1, 0, 0, 1, 0, 0, 1, 0]], jnp.float32)
    x = x.at[:, :, -1].set(alert_flags)

    # Deterministic ring + extra edges per graph (directed src -> dst).
    src0 = jnp.array([0, 1, 2, 3, 4, 5, 6, 7, 0, 2, 4], jnp.int32)
    dst0 = jnp.array([1, 2, 3, 4, 5, 6, 7, 0, 4, 6, 1], jnp.int32)
    src1 = jnp.array([7, 6, 5, 4, 3, 2, 1, 0, 1, 3, 5], jnp.int32)
    dst1 = jnp.array([6, 5, 4, 3, 2, 1, 0, 7, 5, 7, 0], jnp.int32)
    edge_index = jnp.stack([jnp.stack([src0, dst0]),
                            jnp.stack([src1, dst1])], axis=0)   # [B, 2, E]

    params = make_params(k_p, input_dim=input_dim, hidden_dims=(64, 32))
    w_mm, w_vec = pack_params(params, input_dim=input_dim, hidden_dims=(64, 32))

    out = ionm_gnn_forward(x, edge_index, w_mm, w_vec, hidden_dims=(64, 32))
    out = jax.block_until_ready(out)
    assert out.shape == (batch, 1)
    assert bool(jnp.all((out > 0.0) & (out < 1.0)))
    print("KERNEL_OK")
</pallas_src>

<mosaic_0001>
module attributes {stable_mosaic.version = 11 : i64} {
  func.func @kernel(%arg0: i32, %arg1: memref<1x8x16xf32, #tpu.memory_space<vmem>>, %arg2: memref<1x8x8xbf16, #tpu.memory_space<vmem>>, %arg3: memref<192x64xbf16, #tpu.memory_space<vmem>>, %arg4: memref<88x64xf32, #tpu.memory_space<vmem>>, %arg5: memref<1x1x1xf32, #tpu.memory_space<vmem>>) attributes {dimension_semantics = [#tpu.dimension_semantics<parallel>], iteration_bounds = array<i64: 2>, scalar_prefetch = 0 : i64, scratch_operands = 0 : i64, tpu.core_type = #tpu.core_type<tc>, window_params = [{transform_indices = @transform_0, window_bounds = array<i64: 1, 8, 16>}, {transform_indices = @transform_1, window_bounds = array<i64: 1, 8, 8>}, {pipeline_mode = #tpu.pipeline_mode<synchronous>, transform_indices = @transform_2, window_bounds = array<i64: 192, 64>}, {pipeline_mode = #tpu.pipeline_mode<synchronous>, transform_indices = @transform_3, window_bounds = array<i64: 88, 64>}, {transform_indices = @transform_4, window_bounds = array<i64: 1, 1, 1>}]} {
    %c0 = arith.constant 0 : index
    %c0_0 = arith.constant 0 : index
    %c0_1 = arith.constant 0 : index
    %0 = vector.load %arg1[%c0, %c0_0, %c0_1] : memref<1x8x16xf32, #tpu.memory_space<vmem>>, vector<1x8x16xf32>
    %1 = vector.shape_cast %0 : vector<1x8x16xf32> to vector<8x16xf32>
    %c0_2 = arith.constant 0 : index
    %c0_3 = arith.constant 0 : index
    %c0_4 = arith.constant 0 : index
    %2 = vector.load %arg2[%c0_2, %c0_3, %c0_4] : memref<1x8x8xbf16, #tpu.memory_space<vmem>>, vector<1x8x8xbf16>
    %3 = vector.shape_cast %2 : vector<1x8x8xbf16> to vector<8x8xbf16>
    %4 = vector.extract_strided_slice %1 {offsets = [0, 15], sizes = [8, 1], strides = [1, 1]} : vector<8x16xf32> to vector<8x1xf32>
    %5 = arith.truncf %1 : vector<8x16xf32> to vector<8x16xbf16>
    %cst = arith.constant dense<0.000000e+00> : vector<8x16xf32>
    %6 = tpu.matmul %3, %5, %cst {dimension_numbers = #tpu.dot_dimension_numbers<[1], [0], [0], [1], [0, 0, 1, 1], [], []>} : vector<8x8xbf16>, vector<8x16xbf16>, vector<8x16xf32> -> vector<8x16xf32>
    %7 = arith.truncf %6 : vector<8x16xf32> to vector<8x16xbf16>
    %8 = tpu.concatenate %5, %7 in 1 : vector<8x16xbf16>, vector<8x16xbf16> -> vector<8x32xbf16>
    %c0_5 = arith.constant 0 : index
    %c0_6 = arith.constant 0 : index
    %9 = vector.load %arg3[%c0_5, %c0_6] : memref<192x64xbf16, #tpu.memory_space<vmem>>, vector<32x64xbf16>
    %cst_7 = arith.constant dense<0.000000e+00> : vector<8x64xf32>
    %10 = tpu.matmul %8, %9, %cst_7 {dimension_numbers = #tpu.dot_dimension_numbers<[1], [0], [0], [1], [0, 0, 1, 1], [], []>} : vector<8x32xbf16>, vector<32x64xbf16>, vector<8x64xf32> -> vector<8x64xf32>
    %c0_8 = arith.constant 0 : index
    %c0_9 = arith.constant 0 : index
    %11 = vector.load %arg4[%c0_8, %c0_9] : memref<88x64xf32, #tpu.memory_space<vmem>>, vector<1x64xf32>
    %12 = vector.broadcast %11 : vector<1x64xf32> to vector<8x64xf32>
    %13 = arith.addf %10, %12 : vector<8x64xf32>
    %cst_10 = arith.constant 0.000000e+00 : f32
    %14 = vector.broadcast %cst_10 : f32 to vector<8x64xf32>
    %15 = arith.maximumf %13, %14 : vector<8x64xf32>
    %16 = arith.truncf %15 : vector<8x64xf32> to vector<8x64xbf16>
    %cst_11 = arith.constant dense<0.000000e+00> : vector<8x64xf32>
    %17 = tpu.matmul %3, %16, %cst_11 {dimension_numbers = #tpu.dot_dimension_numbers<[1], [0], [0], [1], [0, 0, 1, 1], [], []>} : vector<8x8xbf16>, vector<8x64xbf16>, vector<8x64xf32> -> vector<8x64xf32>
    %18 = arith.truncf %17 : vector<8x64xf32> to vector<8x64xbf16>
    %19 = tpu.concatenate %16, %18 in 1 : vector<8x64xbf16>, vector<8x64xbf16> -> vector<8x128xbf16>
    %c32 = arith.constant 32 : index
    %c0_12 = arith.constant 0 : index
    %20 = vector.load %arg3[%c32, %c0_12] : memref<192x64xbf16, #tpu.memory_space<vmem>>, vector<128x32xbf16>
    %cst_13 = arith.constant dense<0.000000e+00> : vector<8x32xf32>
    %21 = tpu.matmul %19, %20, %cst_13 {dimension_numbers = #tpu.dot_dimension_numbers<[1], [0], [0], [1], [0, 0, 1, 1], [], []>} : vector<8x128xbf16>, vector<128x32xbf16>, vector<8x32xf32> -> vector<8x32xf32>
    %c8 = arith.constant 8 : index
    %c0_14 = arith.constant 0 : index
    %22 = vector.load %arg4[%c8, %c0_14] : memref<88x64xf32, #tpu.memory_space<vmem>>, vector<1x32xf32>
    %23 = vector.broadcast %22 : vector<1x32xf32> to vector<8x32xf32>
    %24 = arith.addf %21, %23 : vector<8x32xf32>
    %cst_15 = arith.constant 0.000000e+00 : f32
    %25 = vector.broadcast %cst_15 : f32 to vector<8x32xf32>
    %26 = arith.maximumf %24, %25 : vector<8x32xf32>
    %27 = arith.truncf %26 : vector<8x32xf32> to vector<8x32xbf16>
    %c160 = arith.constant 160 : index
    %c0_16 = arith.constant 0 : index
    %28 = vector.load %arg3[%c160, %c0_16] : memref<192x64xbf16, #tpu.memory_space<vmem>>, vector<32x32xbf16>
    %cst_17 = arith.constant dense<0.000000e+00> : vector<8x32xf32>
    %29 = tpu.matmul %27, %28, %cst_17 {dimension_numbers = #tpu.dot_dimension_numbers<[1], [0], [0], [1], [0, 0, 1, 1], [], []>} : vector<8x32xbf16>, vector<32x32xbf16>, vector<8x32xf32> -> vector<8x32xf32>
    %c16 = arith.constant 16 : index
    %c0_18 = arith.constant 0 : index
    %30 = vector.load %arg4[%c16, %c0_18] : memref<88x64xf32, #tpu.memory_space<vmem>>, vector<1x32xf32>
    %31 = vector.broadcast %30 : vector<1x32xf32> to vector<8x32xf32>
    %32 = arith.addf %29, %31 : vector<8x32xf32>
    %33 = math.tanh %32 : vector<8x32xf32>
    %c24 = arith.constant 24 : index
    %c0_19 = arith.constant 0 : index
    %34 = vector.load %arg4[%c24, %c0_19] : memref<88x64xf32, #tpu.memory_space<vmem>>, vector<1x32xf32>
    %35 = vector.broadcast %34 : vector<1x32xf32> to vector<8x32xf32>
    %36 = arith.mulf %33, %35 : vector<8x32xf32>
    %cst_20 = arith.constant dense<0.000000e+00> : vector<8xf32>
    %37 = vector.multi_reduction <add>, %36, %cst_20 [1] : vector<8x32xf32> to vector<8xf32>
    %38 = vector.shape_cast %37 : vector<8xf32> to vector<8x1xf32>
    %cst_21 = arith.constant 4.000000e-01 : f32
    %39 = vector.broadcast %cst_21 : f32 to vector<8x1xf32>
    %40 = arith.mulf %4, %39 : vector<8x1xf32>
    %41 = arith.addf %38, %40 : vector<8x1xf32>
    %cst_22 = arith.constant dense<0xFF800000> : vector<1xf32>
    %42 = vector.multi_reduction <maximumf>, %41, %cst_22 [0] : vector<8x1xf32> to vector<1xf32>
    %43 = vector.shape_cast %42 : vector<1xf32> to vector<1x1xf32>
    %44 = vector.broadcast %43 : vector<1x1xf32> to vector<8x1xf32>
    %45 = arith.subf %41, %44 : vector<8x1xf32>
    %46 = math.exp %45 : vector<8x1xf32>
    %cst_23 = arith.constant dense<0.000000e+00> : vector<1xf32>
    %47 = vector.multi_reduction <add>, %46, %cst_23 [0] : vector<8x1xf32> to vector<1xf32>
    %48 = vector.shape_cast %47 : vector<1xf32> to vector<1x1xf32>
    %49 = tpu.reciprocal %48 {approx = true} : vector<1x1xf32> -> vector<1x1xf32>
    %50 = vector.broadcast %49 : vector<1x1xf32> to vector<8x1xf32>
    %51 = arith.mulf %46, %50 : vector<8x1xf32>
    %52 = vector.broadcast %51 : vector<8x1xf32> to vector<8x32xf32>
    %53 = arith.mulf %26, %52 : vector<8x32xf32>
    %cst_24 = arith.constant dense<0.000000e+00> : vector<32xf32>
    %54 = vector.multi_reduction <add>, %53, %cst_24 [0] : vector<8x32xf32> to vector<32xf32>
    %55 = vector.shape_cast %54 : vector<32xf32> to vector<1x32xf32>
    %cst_25 = arith.constant 8.000000e+00 : f32
    %56 = vector.broadcast %cst_25 : f32 to vector<1x32xf32>
    %57 = arith.divf %55, %56 : vector<1x32xf32>
    %c32_26 = arith.constant 32 : index
    %c0_27 = arith.constant 0 : index
    %58 = vector.load %arg4[%c32_26, %c0_27] : memref<88x64xf32, #tpu.memory_space<vmem>>, vector<16x32xf32>
    %59 = vector.broadcast %57 : vector<1x32xf32> to vector<16x32xf32>
    %60 = arith.mulf %59, %58 : vector<16x32xf32>
    %cst_28 = arith.constant dense<0.000000e+00> : vector<16xf32>
    %61 = vector.multi_reduction <add>, %60, %cst_28 [1] : vector<16x32xf32> to vector<16xf32>
    %62 = vector.shape_cast %61 : vector<16xf32> to vector<16x1xf32>
    %c48 = arith.constant 48 : index
    %c0_29 = arith.constant 0 : index
    %63 = vector.load %arg4[%c48, %c0_29] : memref<88x64xf32, #tpu.memory_space<vmem>>, vector<16x1xf32>
    %64 = arith.addf %62, %63 : vector<16x1xf32>
    %cst_30 = arith.constant 0.000000e+00 : f32
    %65 = vector.broadcast %cst_30 : f32 to vector<16x1xf32>
    %66 = arith.maximumf %64, %65 : vector<16x1xf32>
    %c64 = arith.constant 64 : index
    %c0_31 = arith.constant 0 : index
    %67 = vector.load %arg4[%c64, %c0_31] : memref<88x64xf32, #tpu.memory_space<vmem>>, vector<16x1xf32>
    %68 = arith.mulf %66, %67 : vector<16x1xf32>
    %cst_32 = arith.constant dense<0.000000e+00> : vector<1xf32>
    %69 = vector.multi_reduction <add>, %68, %cst_32 [0] : vector<16x1xf32> to vector<1xf32>
    %70 = vector.shape_cast %69 : vector<1xf32> to vector<1x1xf32>
    %c80 = arith.constant 80 : index
    %c0_33 = arith.constant 0 : index
    %71 = vector.load %arg4[%c80, %c0_33] : memref<88x64xf32, #tpu.memory_space<vmem>>, vector<1x1xf32>
    %72 = arith.addf %70, %71 : vector<1x1xf32>
    %cst_34 = arith.constant 0.000000e+00 : f32
    %73 = vector.broadcast %cst_34 : f32 to vector<1x1xf32>
    %74 = arith.subf %73, %72 : vector<1x1xf32>
    %75 = math.exp %74 : vector<1x1xf32>
    %cst_35 = arith.constant 1.000000e+00 : f32
    %76 = vector.broadcast %cst_35 : f32 to vector<1x1xf32>
    %77 = arith.addf %76, %75 : vector<1x1xf32>
    %cst_36 = arith.constant 1.000000e+00 : f32
    %78 = vector.broadcast %cst_36 : f32 to vector<1x1xf32>
    %79 = arith.divf %78, %77 : vector<1x1xf32>
    %c0_37 = arith.constant 0 : index
    %c0_38 = arith.constant 0 : index
    %c0_39 = arith.constant 0 : index
    %80 = vector.load %arg5[%c0_37, %c0_38, %c0_39] : memref<1x1x1xf32, #tpu.memory_space<vmem>>, vector<1x1x1xf32>
    %81 = vector.shape_cast %80 : vector<1x1x1xf32> to vector<1x1xf32>
    %82 = vector.shape_cast %79 : vector<1x1xf32> to vector<1x1x1xf32>
    tpu.vector_store %arg5[%c0_37, %c0_38, %c0_39], %82 {strides = array<i32>} : memref<1x1x1xf32, #tpu.memory_space<vmem>>, vector<1x1x1xf32>,
    return
  }
  func.func @transform_0(%arg0: i32) -> (i32, i32, i32) {
    %c0_i32 = arith.constant 0 : i32
    %c0_i32_0 = arith.constant 0 : i32
    %c0_i32_1 = arith.constant 0 : i32
    return %arg0, %c0_i32, %c0_i32_0 : i32, i32, i32
  }
  func.func @transform_1(%arg0: i32) -> (i32, i32, i32) {
    %c0_i32 = arith.constant 0 : i32
    %c0_i32_0 = arith.constant 0 : i32
    %c0_i32_1 = arith.constant 0 : i32
    return %arg0, %c0_i32, %c0_i32_0 : i32, i32, i32
  }
  func.func @transform_2(%arg0: i32) -> (i32, i32) {
    %c0_i32 = arith.constant 0 : i32
    %c0_i32_0 = arith.constant 0 : i32
    %c0_i32_1 = arith.constant 0 : i32
    return %c0_i32, %c0_i32_0 : i32, i32
  }
  func.func @transform_3(%arg0: i32) -> (i32, i32) {
    %c0_i32 = arith.constant 0 : i32
    %c0_i32_0 = arith.constant 0 : i32
    %c0_i32_1 = arith.constant 0 : i32
    return %c0_i32, %c0_i32_0 : i32, i32
  }
  func.func @transform_4(%arg0: i32) -> (i32, i32, i32) {
    %c0_i32 = arith.constant 0 : i32
    %c0_i32_0 = arith.constant 0 : i32
    %c0_i32_1 = arith.constant 0 : i32
    return %arg0, %c0_i32, %c0_i32_0 : i32, i32, i32
  }
}

</mosaic_0001>

<bundles_post_ra>
// kernel: ionm_gnn_forward.1
= control target key start
LH: loop header
LB: loop body
LE: loop exit
PB: predicated region body
PF: predicated region fallthrough
CT: control target
= control target key end

     0   :  { %s876_s15 = smov 0   ;;  %s1009_s0 = inlined_call_operand.vmem [shape: f32[2,8,16], index: 0, kind: input, shape index: {}]   ;;  %s1010_s1 = inlined_call_operand.vmem [shape: bf16[2,8,8], index: 1, kind: input, shape index: {}]   ;;  %s1011_s2 = inlined_call_operand.vmem [shape: bf16[192,64], index: 2, kind: input, shape index: {}]   ;;  %s1012_s3 = inlined_call_operand.vmem [shape: f32[88,64], index: 3, kind: input, shape index: {}]   ;;  %s1013_s4 = inlined_call_operand.vmem [shape: f32[2,1,1], index: 4, kind: output, shape index: {}]  }
   0x1 LB: > { %s705_s16 = sadd.s32 4294967295, %s844_s15   ;;  %p709_p0 = scmp.ge.s32.totalorder %s844_s15, 1  ;;  %s844_s15 = sphi %s876_s15, %s14_s15  }
   0x2   : > { %p170_p1 = scmp.lt.s32.totalorder %s844_s15, 3 }
   0x4   : > { %p171_p2 = pnand %p709_p0, %p170_p1 }
   0x5   : > { %p197_p3 = scmp.lt.s32.totalorder (!%p171_p2), %s705_s16, 1  ;;  %v846_v0 = vmov (!%p171_p2), 0.0   ;;  %vm847_vm0 = vmmov (!%p171_p2), 0   ;;  %vm216_vm1 = vcmask (!%p171_p2), 1043456   ;;  %vm212_vm2 = vcmask (!%p171_p2), 64512   ;;  %v816_v5 = vld [vmem:[%s1011_s2] sm:$0xff] (!%p171_p2)  }
   0x6   : > { %174 = sbr.rel (%p171_p2) target bundleno = 1891 (0x763), region = 36  ;;  %753 = vmatprep.subr.bf16.mxu0 (!%p171_p2), %v846_v0  ;;  %755 = vmatprep.mubr.msk.bf16.mxu0 (!%p171_p2), %vm847_vm0, %v846_v0  ;;  %v817_v6 = vld [vmem:[%s1011_s2 + $0x8] sm:$0xff] (!%p171_p2)   ;;  %s848_s29 = smov (!%p171_p2), 16   ;;  %vm264_vm3 = vcmask (!%p171_p2), 130048   ;;  %vm288_vm4 = vcmask (!%p171_p2), 261120   ;;  %v818_v23 = vld [vmem:[%s1011_s2 + $0x10] sm:$0xff] (!%p171_p2)  }
   0x7   : > { %773 = vmatprep.subr.bf16.mxu1 (!%p171_p2), %v846_v0  ;;  %789 = vmatprep.mubr.msk.bf16.mxu1 (!%p171_p2), %vm847_vm0, %v846_v0  ;;  %v713_v14 = vld [vmem:[%s1012_s3] ss:$0 sm:$0xff] (!%p171_p2)  ;;  %v819_v24 = vld [vmem:[%s1011_s2 + $0x18] sm:$0xff] (!%p171_p2)   ;;  %v821_v26 = vld [vmem:[%s1011_s2 + $0x28] sm:$0xff] (!%p171_p2)   ;;  %vm380_vm5 = vcmask (!%p171_p2), 523264   ;;  %v850_v58 = vmov (!%p171_p2), 15  }
   0x8   : > { %774 = vmatpush3.bf16.msra.mxu1 (!%p171_p2), %v818_v23  ;;  %v820_v25 = vld [vmem:[%s1011_s2 + $0x20] sm:$0xff] (!%p171_p2)   ;;  %v822_v27 = vld [vmem:[%s1011_s2 + $0x30] sm:$0xff] (!%p171_p2)   ;;  %v823_v28 = vld [vmem:[%s1011_s2 + $0x38] sm:$0xff] (!%p171_p2)   ;;  %814 = vset.pattern.permute.xlu1 (!%p171_p2), %v850_v58  ;;  %vm571_vm6 = vcmask (!%p171_p2), 130168   ;;  %vm626_vm7 = vcmask (!%p171_p2), 7168   ;;  %vm644_vm8 = vcmask (!%p171_p2), 0  }
   0x9   : > { %775 = vmatprep.subr.bf16.mxu1 (!%p171_p2), %v846_v0  ;;  %v824_v29 = vld [vmem:[%s1011_s2 + $0x40] sm:$0xff] (!%p171_p2)   ;;  %v825_v30 = vld [vmem:[%s1011_s2 + $0x48] sm:$0xff] (!%p171_p2)   ;;  %v826_v38 = vld [vmem:[%s1011_s2 + $0x50] sm:$0xff] (!%p171_p2)   ;;  %815 = vset.pattern.permute.xlu0 (!%p171_p2), %v850_v58 }
   0xa   : > { %v827_v39 = vld [vmem:[%s1011_s2 + $0x58] sm:$0xff] (!%p171_p2)   ;;  %v718_v40 = vld [vmem:[%s1012_s3 + $0x8] ss:$0 sm:$0xff] (!%p171_p2)  ;;  %v727_v48 = vld [vmem:[%s1012_s3 + $0x10] ss:$0 sm:$0xff] (!%p171_p2) }
   0xb   : > { %v731_v54 = vld [vmem:[%s1012_s3 + $0x18] ss:$0 sm:$0xff] (!%p171_p2) }
   0xc   : > { %776 = vmatpush3.bf16.msra.mxu1 (!%p171_p2), %v819_v24 }
   0xd   : > { %s1015_s16 = smov (!%p197_p3, %s705_s16), 1  ;;  %777 = vmatprep.subr.bf16.mxu1 %v846_v0 }
   0xe   : > { %s710_s17 = sshll.u32 %s1015_s16, 3  ;;  %s711_s21 = sshll.u32 %s1015_s16, 2 }
   0xf   : > { %s200_s20 = scalar_lea.vmem %s1009_s0, %s710_s17  ;;  %s204_s24 = scalar_lea.vmem %s1010_s1, %s711_s21 }
  0x10   : > { %v897_v1 = vld [vmem:[%s200_s20] sm:$0xff]  ;;  %778 = vmatpush3.bf16.msra.mxu1 %v820_v25  ;;  %s207_s27 = scalar_lea.vmem %s1013_s4, %s1015_s16 }
  0x11   : > { %v211_v2 = vpack.c.bf16 %v897_v1, %v897_v1  ;;  %v210_v3 = vld [vmem:[%s204_s24] sm:$0xf]  ;;  %779 = vmatprep.subr.bf16.mxu1 %v846_v0  ;;  %s849_s24 = smov 64   ;;  %v569_v59 = vmul.f32 0.4, %v897_v1 }
  0x13   : > { %v218_v4 = vsel %vm216_vm1, %v211_v2, 0 }
  0x14   : > { %754 = vmatpush3.bf16.msra.mxu0 %v218_v4  ;;  %780 = vmatpush3.bf16.msra.mxu1 %v821_v26  ;;  %v607_v26 = vld [vmem:[%s1012_s3 + $0x28] sm:$0xff] }
  0x15   : > { %759 = vmatprep.subr.bf16.mxu0 %v846_v0  ;;  %781 = vmatprep.subr.bf16.mxu1 %v846_v0 }
  0x17   : > { %756 = vmatmul.mubr.msk.bf16.vlgmr.msra.gmra.mrb[0].mxu0 %vm212_vm2, %v210_v3 }
  0x18   : > { %763 = vmatprep.mubr.msk.bf16.mxu0 %vm847_vm0, %v846_v0  ;;  %760 = vmatpush3.bf16.msra.mxu0 %v816_v5 }
  0x19   : > { %761 = vmatprep.subr.bf16.mxu0 %v846_v0  ;;  %782 = vmatpush3.bf16.msra.mxu1 %v822_v27  ;;  %v606_v27 = vld [vmem:[%s1012_s3 + $0x20] sm:$0xff] }
  0x1a   : > { %783 = vmatprep.subr.bf16.mxu1 %v846_v0 }
  0x1c   : > { %762 = vmatpush3.bf16.msra.mxu0 %v817_v6 }
  0x1d   : > { %767 = vmatprep.subr.bf16.mxu0 %v846_v0  ;;  %784 = vmatpush3.bf16.msra.mxu1 %v823_v28 }
  0x1e   : > { %785 = vmatprep.subr.bf16.mxu1 %v846_v0 }
  0x21   : > { %786 = vmatpush3.bf16.msra.mxu1 %v824_v29 }
  0x22   : > { %787 = vmatprep.subr.bf16.mxu1 %v846_v0 }
  0x25   : > { %788 = vmatpush3.bf16.msra.mxu1 %v825_v30 }
  0xea   : > { %v254_v7 = vpop.f32.mrb[0].mxu0 }
  0xeb   : > { %v260_v8 = vpack.c.bf16 %v254_v7, %v254_v7  ;;  %v757_v9 = vpop.f32.mrb[1].mxu0 }
  0xec   : > { %v257_v10 = vpop.f32.mrb[2].mxu0 }
  0xed   : > { %262 = vrot.lane.b32.xlu0 %v260_v8, %s848_s29  ;;  %v758_v11 = vpop.f32.mrb[3].mxu0 }
 0x15f   : > { %v263_v12 = vpop.permute.xlu0 %262 }
 0x160   : > { %v266_v13 = vsel %vm264_vm3, %v211_v2, %v263_v12 }
 0x161   : > { %764 = vmatmul.mubr.msk.bf16.vlgmr.msra.gmra.mrb[4].mxu0 %vm288_vm4, %v266_v13 }
 0x162   : > { %769 = vmatprep.mubr.msk.bf16.mxu0 %vm847_vm0, %v846_v0 }
 0x234   : > { %v325_v15 = vpop.f32.mrb[4].mxu0 }
 0x235   : > { %v326_v16 = vadd.f32 %v713_v14, %v325_v15  ;;  %v765_v17 = vpop.f32.mrb[5].mxu0 }
 0x236   : > { %v328_v18 = vpop.f32.mrb[6].mxu0 }
 0x237   : > { %v331_v19 = vmax.f32 %v326_v16, 0.0  ;;  %v766_v20 = vpop.f32.mrb[7].mxu0 }
 0x239   : > { %v332_v21 = vpack.c.bf16 %v331_v19, %v331_v19 }
 0x23b   : > { %v334_v22 = vsel %vm216_vm1, %v332_v21, 0 }
 0x23c   : > { %768 = vmatpush3.bf16.msra.mxu0 %v334_v22 }
 0x23d   : > { %793 = vmatprep.subr.bf16.mxu0 %v846_v0 }
 0x23f   : > { %770 = vmatmul.mubr.msk.bf16.vlgmr.msra.gmra.mrb[8].mxu0 %vm212_vm2, %v210_v3 }
 0x240   : > { %797 = vmatprep.mubr.msk.bf16.mxu0 %vm847_vm0, %v846_v0  ;;  %794 = vmatpush3.bf16.msra.mxu0 %v826_v38 }
 0x241   : > { %795 = vmatprep.subr.bf16.mxu0 %v846_v0 }
 0x244   : > { %796 = vmatpush3.bf16.msra.mxu0 %v827_v39  ;;  %v623_v39 = vld [vmem:[%s1012_s3 + $0x48] sm:$0xff] }
 0x312   : > { %v370_v31 = vpop.f32.mrb[8].mxu0 }
 0x313   : > { %v376_v32 = vpack.c.bf16 %v370_v31, %v370_v31  ;;  %v771_v33 = vpop.f32.mrb[9].mxu0 }
 0x314   : > { %v373_v34 = vpop.f32.mrb[10].mxu0  ;;  %v617_v33 = vld [vmem:[%s1012_s3 + $0x38] sm:$0xff] }
 0x315   : > { %378 = vrot.lane.b32.xlu0 %v376_v32, %s849_s24  ;;  %v772_v35 = vpop.f32.mrb[11].mxu0  ;;  %v616_v34 = vld [vmem:[%s1012_s3 + $0x30] sm:$0xff] }
 0x387   : > { %v379_v36 = vpop.permute.xlu0 %378 }
 0x388   : > { %v382_v37 = vsel %vm380_vm5, %v332_v21, %v379_v36 }
 0x389   : > { %790 = vmatmul.mubr.bf16.vlgmr.msra.gmra.mrb[0].mxu1 %v382_v37 }
 0x45c   : > { %v487_v41 = vpop.f32.mrb[0].mxu1 }
 0x45d   : > { %v488_v42 = vadd.f32 %v718_v40, %v487_v41  ;;  %v791_v43 = vpop.f32.mrb[1].mxu1  ;;  %v622_v40 = vld [vmem:[%s1012_s3 + $0x40] sm:$0xff] }
 0x45e   : > { %v490_v44 = vpop.f32.mrb[2].mxu1 }
 0x45f   : > { %v493_v45 = vmax.f32 %v488_v42, 0.0  ;;  %v792_v46 = vpop.f32.mrb[3].mxu1 }
 0x461   : > { %v494_v47 = vpack.c.bf16 %v493_v45, %v493_v45 }
 0x463   : > { %798 = vmatmul.mubr.msk.bf16.vlgmr.msra.gmra.mrb[12].mxu0 %vm288_vm4, %v494_v47 }
 0x536   : > { %v553_v49 = vpop.f32.mrb[12].mxu0 }
 0x537   : > { %v554_v50 = vadd.f32 %v727_v48, %v553_v49  ;;  %v799_v51 = vpop.f32.mrb[13].mxu0 }
 0x538   : > { %v556_v52 = vpop.f32.mrb[14].mxu0 }
 0x539   : > { %828 = vtanh.f32 %v554_v50  ;;  %v800_v53 = vpop.f32.mrb[15].mxu0 }
 0x53a   : > { %v636_v53 = vld [vmem:[%s1012_s3 + $0x50] sm:$0x1] }
 0x543   : > { %v829_v55 = vpop.eup %828 }
 0x544   : > { %v565_v56 = vmul.f32 %v829_v55, %v731_v54 }
 0x546   : > { %v566_v57 = vsel %vm288_vm4, %v565_v56, 0.0 }
 0x547   : > { %567 = vadd.xlane.f32.xlu1 %v566_v57 }
 0x5d4   : > { %v568_v60 = vpop.xlane.xlu1 %567 }
 0x5d5   : > { %v570_v61 = vadd.f32 %v569_v59, %v568_v60 }
 0x5d7   : > { %v572_v62 = vsel %vm571_vm6, %v570_v61, -inf }
 0x5d8   : > { %v573_v63 = vrot.slane %v572_v62, 4 }
 0x5da   : > { %v574_v0 = vmax.f32 %v572_v62, %v573_v63 }
 0x5dc   : > { %v575_v2 = vrot.slane %v574_v0, 2 }
 0x5de   : > { %v576_v3 = vmax.f32 %v574_v0, %v575_v2 }
 0x5e0   : > { %v577_v4 = vrot.slane %v576_v3, 1 }
 0x5e2   : > { %v578_v5 = vmax.f32 %v576_v3, %v577_v4 }
 0x5e4   : > { %v579_v6 = vsub.f32 %v570_v61, %v578_v5 }
 0x5e6   : > { %v580_v7 = vmul.f32 1.442695, %v579_v6 }
 0x5e8   : > { %830 = vpow2.f32 %v580_v7 }
 0x5f2   : > { %v831_v8 = vpop.eup %830 }
 0x5f3   : > { %v582_v9 = vsel %vm571_vm6, %v831_v8, 0.0 }
 0x5f4   : > { %v583_v10 = vrot.slane %v582_v9, 4 }
 0x5f6   : > { %v584_v11 = vadd.f32 %v583_v10, %v582_v9 }
 0x5f8   : > { %v585_v12 = vrot.slane %v584_v11, 2 }
 0x5fa   : > { %v586_v13 = vadd.f32 %v585_v12, %v584_v11 }
 0x5fc   : > { %v587_v1 = vrot.slane %v586_v13, 1 }
 0x5fe   : > { %v588_v14 = vadd.f32 %v587_v1, %v586_v13 }
 0x600   : > { %832 = vrcp.f32 %v588_v14 }
 0x60a   : > { %v833_v15 = vpop.eup %832 }
 0x60b   : > { %v590_v16 = vmul.f32 %v833_v15, %v831_v8 }
 0x60d   : > { %593 = vperm.xlu1 %814, %v590_v16  }
 0x68c   : > { %v594_v17 = vpop.permute.xlu1 %593 }
 0x68d   : > { %v596_v18 = vmul.f32 %v594_v17, %v493_v45 }
 0x68f   : > { %v597_v19 = vsel %vm288_vm4, %v596_v18, 0.0 }
 0x690   : > { %v598_v20 = vrot.slane %v597_v19, 4 }
 0x692   : > { %v599_v21 = vadd.f32 %v598_v20, %v597_v19 }
 0x694   : > { %v600_v22 = vrot.slane %v599_v21, 2 }
 0x696   : > { %v601_v23 = vadd.f32 %v600_v22, %v599_v21 }
 0x698   : > { %v602_v24 = vrot.slane %v601_v23, 1 }
 0x69a   : > { %v603_v25 = vadd.f32 %v602_v24, %v601_v23 }
 0x69c   : > { %v605_v28 = vmul.f32 0.125, %v603_v25 }
 0x69e   : > { %v609_v29 = vmul.f32 %v607_v26, %v605_v28  ;;  %v608_v30 = vmul.f32 %v606_v27, %v605_v28 }
 0x6a0   : > { %v613_v31 = vsel %vm288_vm4, %v609_v29, 0.0  ;;  %v610_v32 = vsel %vm288_vm4, %v608_v30, 0.0 }
 0x6a1   : > { %614 = vadd.xlane.f32.xlu1 %v613_v31  ;;  %611 = vadd.xlane.f32.xlu0 %v610_v32 }
 0x72e   : > { %v615_v35 = vpop.xlane.xlu1 %614  ;;  %v612_v36 = vpop.xlane.xlu0 %611 }
 0x72f   : > { %v619_v37 = vadd.f32 %v617_v33, %v615_v35  ;;  %v618_v38 = vadd.f32 %v616_v34, %v612_v36 }
 0x731   : > { %v621_v41 = vmax.f32 %v619_v37, 0.0  ;;  %v620_v42 = vmax.f32 %v618_v38, 0.0 }
 0x733   : > { %v625_v43 = vmul.f32 %v623_v39, %v621_v41  ;;  %v624_v44 = vmul.f32 %v622_v40, %v620_v42 }
 0x735   : > { %v628_v45 = vsel %vm626_vm7, %v625_v43, 0.0  ;;  %v627_v46 = vsel %vm626_vm7, %v624_v44, 0.0 }
 0x736   : > { %v629_v47 = vadd.f32 %v628_v45, %v627_v46 }
 0x738   : > { %v630_v48 = vrot.slane %v629_v47, 4 }
 0x73a   : > { %v631_v49 = vadd.f32 %v630_v48, %v629_v47 }
 0x73c   : > { %v632_v50 = vrot.slane %v631_v49, 2 }
 0x73e   : > { %v633_v51 = vadd.f32 %v632_v50, %v631_v49 }
 0x740   : > { %v634_v52 = vrot.slane %v633_v51, 1 }
 0x742   : > { %v635_v54 = vadd.f32 %v634_v52, %v633_v51 }
 0x744   : > { %v637_v55 = vadd.f32 %v636_v53, %v635_v54 }
 0x746   : > { %v638_v56 = vsub.f32 0.0, %v637_v55 }
 0x748   : > { %v639_v57 = vmul.f32 1.442695, %v638_v56 }
 0x74a   : > { %834 = vpow2.f32 %v639_v57 }
 0x754   : > { %v835_v58 = vpop.eup %834 }
 0x755   : > { %v641_v59 = vadd.f32 1.0, %v835_v58 }
 0x757   : > { %836 = vrcp.f32 %v641_v59 }
 0x761   : > { %v837_v60 = vpop.eup %836 }
 0x762   : > { %645 = vst.msk [vmem:[%s207_s27] sm:$0x1] %vm644_vm8, %v837_v60 }
 0x763 PF: > { %s14_s15 = sadd.s32 1, %s844_s15  }
 0x764   : > { %p11_p4 = scmp.ge.s32.totalorder %s14_s15, 4  }
 0x766   :  { %13 = sbr.rel (!%p11_p4) target bundleno = 1 (0x1), region = 69 }

</bundles_post_ra>
